<compile_context>
chip_gen: v5e
topology: v5e:2x2
jax: 0.10.0
libtpu: 0.0.40
codegen_flags: <defaults>
</compile_context>

<pallas_src>
import jax
import jax.numpy as jnp
from jax import lax
from jax.experimental import pallas as pl
from jax.experimental.pallas import tpu as pltpu

NUM_INPUTS = 784
NUM_OUTPUTS = 10
N_PAD = 128  # lane-dense output width (multiple of 128)


def linear_kernel(x_ref, w_ref, b_ref, o_ref):
    # x_ref: (B, 784)      in VMEM
    # w_ref: (128, 784)    in VMEM  (un-transposed, N padded to 128)
    # b_ref: (1, 128)      in VMEM  (bias padded to 128)
    # o_ref: (B, 128)      in VMEM  (lane-dense output, unmasked stores)
    acc = lax.dot_general(
        x_ref[...],
        w_ref[...],
        dimension_numbers=(((1,), (1,)), ((), ())),  # contract K on both: x @ w.T on MXU
        preferred_element_type=jnp.float32,
    )
    o_ref[...] = (acc + b_ref[...]).astype(o_ref.dtype)


def linear_net_forward(x_nchw, weight, bias):
    """Forward pass of LinearNet: y = flatten(x) @ W^T + b.

    x_nchw: (B, C, H, W) with C*H*W == NUM_INPUTS
    weight: (NUM_OUTPUTS, NUM_INPUTS)   (PyTorch nn.Linear convention, NOT transposed)
    bias:   (NUM_OUTPUTS,)
    returns (B, NUM_OUTPUTS)
    """
    B = x_nchw.shape[0]
    x_flat = x_nchw.reshape(B, -1)  # like torch's x.view(B, -1)

    # Pad the output (N) dimension of the parameters to a lane-dense 128.
    # (Parameters are tiny and in real use would be padded once, offline.)
    w_pad = jnp.zeros((N_PAD, NUM_INPUTS), weight.dtype).at[:NUM_OUTPUTS, :].set(weight)
    b_pad = jnp.zeros((1, N_PAD), bias.dtype).at[0, :NUM_OUTPUTS].set(bias)

    out_padded = pl.pallas_call(
        linear_kernel,
        out_shape=jax.ShapeDtypeStruct((B, N_PAD), x_flat.dtype),
        in_specs=[
            pl.BlockSpec(memory_space=pltpu.MemorySpace.VMEM),
            pl.BlockSpec(memory_space=pltpu.MemorySpace.VMEM),
            pl.BlockSpec(memory_space=pltpu.MemorySpace.VMEM),
        ],
        out_specs=pl.BlockSpec(memory_space=pltpu.MemorySpace.VMEM),
    )(x_flat, w_pad, b_pad)

    return out_padded[:, :NUM_OUTPUTS]


if __name__ == "__main__":
    key = jax.random.PRNGKey(0)
    kx, kw, kb = jax.random.split(key, 3)

    # Small, deterministic example consistent with num_inputs=784:
    # batch=2, NCHW = (2, 1, 28, 28) so that C*H*W = 784.
    B, C, H, W = 2, 1, 28, 28
    x = jax.random.normal(kx, (B, C, H, W), dtype=jnp.float32)

    # Deterministic parameter init (shapes from nn.Linear(784, 10)).
    bound = 1.0 / (NUM_INPUTS ** 0.5)
    weight = jax.random.uniform(kw, (NUM_OUTPUTS, NUM_INPUTS),
                                minval=-bound, maxval=bound, dtype=jnp.float32)
    bias = jax.random.uniform(kb, (NUM_OUTPUTS,),
                              minval=-bound, maxval=bound, dtype=jnp.float32)

    y = linear_net_forward(x, weight, bias)
    y = jax.block_until_ready(y)

    # Correctness check against plain-JAX reference.
    y_ref = x.reshape(B, -1) @ weight.T + bias
    assert y.shape == (B, NUM_OUTPUTS)
    assert jnp.allclose(y, y_ref, atol=1e-5, rtol=1e-5)

    print("KERNEL_OK")
</pallas_src>

<mosaic_0001>
module attributes {stable_mosaic.version = 11 : i64} {
  func.func @linear_kernel(%arg0: memref<2x784xf32, #tpu.memory_space<vmem>>, %arg1: memref<128x784xf32, #tpu.memory_space<vmem>>, %arg2: memref<1x128xf32, #tpu.memory_space<vmem>>, %arg3: memref<2x128xf32, #tpu.memory_space<vmem>>) attributes {dimension_semantics = [], scalar_prefetch = 0 : i64, scratch_operands = 0 : i64, tpu.core_type = #tpu.core_type<tc>} {
    %c0 = arith.constant 0 : index
    %c0_0 = arith.constant 0 : index
    %0 = vector.load %arg0[%c0, %c0_0] : memref<2x784xf32, #tpu.memory_space<vmem>>, vector<2x784xf32>
    %c0_1 = arith.constant 0 : index
    %c0_2 = arith.constant 0 : index
    %1 = vector.load %arg1[%c0_1, %c0_2] : memref<128x784xf32, #tpu.memory_space<vmem>>, vector<128x784xf32>
    %cst = arith.constant dense<0.000000e+00> : vector<2x128xf32>
    %2 = tpu.matmul %0, %1, %cst {dimension_numbers = #tpu.dot_dimension_numbers<[1], [1], [0], [0], [0, 0, 1, 0], [], []>} : vector<2x784xf32>, vector<128x784xf32>, vector<2x128xf32> -> vector<2x128xf32>
    %c0_3 = arith.constant 0 : index
    %c0_4 = arith.constant 0 : index
    %3 = vector.load %arg2[%c0_3, %c0_4] : memref<1x128xf32, #tpu.memory_space<vmem>>, vector<1x128xf32>
    %4 = vector.broadcast %3 : vector<1x128xf32> to vector<2x128xf32>
    %5 = arith.addf %2, %4 : vector<2x128xf32>
    %c0_5 = arith.constant 0 : index
    %c0_6 = arith.constant 0 : index
    %6 = vector.load %arg3[%c0_5, %c0_6] : memref<2x128xf32, #tpu.memory_space<vmem>>, vector<2x128xf32>
    tpu.vector_store %arg3[%c0_5, %c0_6], %5 {strides = array<i32>} : memref<2x128xf32, #tpu.memory_space<vmem>>, vector<2x128xf32>,
    return
  }
}

</mosaic_0001>

<bundles_post_ra>
// kernel: tpu_custom_call.1
= control target key start
LH: loop header
LB: loop body
LE: loop exit
PB: predicated region body
PF: predicated region fallthrough
CT: control target
= control target key end

     0   :  { %s790_s0 = inlined_call_operand.vmem [shape: f32[2,784], index: 0, kind: input, shape index: {}]   ;;  %s791_s1 = inlined_call_operand.vmem [shape: f32[128,784], index: 1, kind: input, shape index: {}]   ;;  %s792_s2 = inlined_call_operand.vmem [shape: f32[1,128], index: 2, kind: input, shape index: {}]   ;;  %s793_s3 = inlined_call_operand.hbm [shape: f32[2,128], index: 3, kind: output, shape index: {}]  }
   0x1   :  { %v124_v0 = vld [vmem:[%s791_s1 + $0x358] sm:$0xff]  ;;  %v122_v1 = vld [vmem:[%s791_s1 + $0x348] sm:$0xff]  ;;  %v123_v2 = vld [vmem:[%s791_s1 + $0x350] sm:$0xff] }
   0x2   :  { %242 = vmatpush.xpose.msra.mxu2 %v124_v0  ;;  %202 = vmatpush.xpose.msra.mxu0 %v122_v1  ;;  %v117_v3 = vld [vmem:[%s791_s1 + $0x320] sm:$0xff]  ;;  %v115_v4 = vld [vmem:[%s791_s1 + $0x310] sm:$0xff]  ;;  %v116_v5 = vld [vmem:[%s791_s1 + $0x318] sm:$0xff] }
   0x3   :  { %222 = vmatpush.xpose.msra.mxu1 %v123_v2  ;;  %v110_v6 = vld [vmem:[%s791_s1 + $0x2e8] sm:$0xff]  ;;  %v108_v7 = vld [vmem:[%s791_s1 + $0x2d8] sm:$0xff]  ;;  %v109_v8 = vld [vmem:[%s791_s1 + $0x2e0] sm:$0xff] }
   0x4   :  { %v103_v9 = vld [vmem:[%s791_s1 + $0x2b0] sm:$0xff]  ;;  %v101_v10 = vld [vmem:[%s791_s1 + $0x2a0] sm:$0xff]  ;;  %v102_v11 = vld [vmem:[%s791_s1 + $0x2a8] sm:$0xff] }
   0x6   :  { %243 = vmatpush.xpose.msra.mxu2 %v117_v3  ;;  %203 = vmatpush.xpose.msra.mxu0 %v115_v4 }
   0x7   :  { %223 = vmatpush.xpose.msra.mxu1 %v116_v5 }
   0xa   :  { %244 = vmatpush.xpose.msra.mxu2 %v110_v6  ;;  %204 = vmatpush.xpose.msra.mxu0 %v108_v7 }
   0xb   :  { %224 = vmatpush.xpose.msra.mxu1 %v109_v8 }
   0xc   :  { %8 = vsyncpa [#allocation3], 0  ;;  %v96_v12 = vld [vmem:[%s791_s1 + $0x278] sm:$0xff]  ;;  %v94_v13 = vld [vmem:[%s791_s1 + $0x268] sm:$0xff]  ;;  %vm151_vm0 = vcmask 130048   ;;  %s350_s27 = sshll.u32 %s793_s3, 4  ;;  %s351_s27 = int_to_ptr.hbm [resolvable:$true] %s350_s27 }
   0xd   :  { %v95_v14 = vld [vmem:[%s791_s1 + $0x270] sm:$0xff]  ;;  %v89_v15 = vld [vmem:[%s791_s1 + $0x240] sm:$0xff]  ;;  %v88_v17 = vld [vmem:[%s791_s1 + $0x238] sm:$0xff] }
   0xe   :  { %245 = vmatpush.xpose.msra.mxu2 %v103_v9  ;;  %205 = vmatpush.xpose.msra.mxu0 %v101_v10  ;;  %v87_v16 = vld [vmem:[%s791_s1 + $0x230] sm:$0xff]  ;;  %v125_v18 = vld [vmem:[%s791_s1 + $0x360] sm:$0xff]  ;;  %v82_v19 = vld [vmem:[%s791_s1 + $0x208] sm:$0xff] }
   0xf   :  { %225 = vmatpush.xpose.msra.mxu1 %v102_v11  ;;  %v80_v20 = vld [vmem:[%s791_s1 + $0x1f8] sm:$0xff]  ;;  %262 = vmatpush.xpose.msra.mxu3 %v125_v18  ;;  %v81_v21 = vld [vmem:[%s791_s1 + $0x200] sm:$0xff]  ;;  %v118_v22 = vld [vmem:[%s791_s1 + $0x328] sm:$0xff] }
  0x10   :  { %v75_v23 = vld [vmem:[%s791_s1 + $0x1d0] sm:$0xff]  ;;  %v73_v24 = vld [vmem:[%s791_s1 + $0x1c0] sm:$0xff]  ;;  %v74_v25 = vld [vmem:[%s791_s1 + $0x1c8] sm:$0xff] }
  0x11   :  { %v68_v26 = vld [vmem:[%s791_s1 + $0x198] sm:$0xff]  ;;  %v66_v27 = vld [vmem:[%s791_s1 + $0x188] sm:$0xff]  ;;  %v111_v28 = vld [vmem:[%s791_s1 + $0x2f0] sm:$0xff] }
  0x12   :  { %246 = vmatpush.xpose.msra.mxu2 %v96_v12  ;;  %206 = vmatpush.xpose.msra.mxu0 %v94_v13  ;;  %v67_v29 = vld [vmem:[%s791_s1 + $0x190] sm:$0xff]  ;;  %v61_v30 = vld [vmem:[%s791_s1 + $0x160] sm:$0xff]  ;;  %v104_v32 = vld [vmem:[%s791_s1 + $0x2b8] sm:$0xff] }
  0x13   :  { %226 = vmatpush.xpose.msra.mxu1 %v95_v14  ;;  %263 = vmatpush.xpose.msra.mxu3 %v118_v22  ;;  %v59_v31 = vld [vmem:[%s791_s1 + $0x150] sm:$0xff]  ;;  %v60_v33 = vld [vmem:[%s791_s1 + $0x158] sm:$0xff]  ;;  %v54_v34 = vld [vmem:[%s791_s1 + $0x128] sm:$0xff] }
  0x14   :  { %v52_v35 = vld [vmem:[%s791_s1 + $0x118] sm:$0xff]  ;;  %v97_v36 = vld [vmem:[%s791_s1 + $0x280] sm:$0xff]  ;;  %v47_v38 = vld [vmem:[%s791_s1 + $0xf0] sm:$0xff] }
  0x15   :  { %v53_v37 = vld [vmem:[%s791_s1 + $0x120] sm:$0xff]  ;;  %v90_v40 = vld [vmem:[%s791_s1 + $0x248] sm:$0xff]  ;;  %v40_v42 = vld [vmem:[%s791_s1 + $0xb8] sm:$0xff] }
  0x16   :  { %247 = vmatpush.xpose.msra.mxu2 %v89_v15  ;;  %207 = vmatpush.xpose.msra.mxu0 %v87_v16  ;;  %v45_v39 = vld [vmem:[%s791_s1 + $0xe0] sm:$0xff]  ;;  %v46_v41 = vld [vmem:[%s791_s1 + $0xe8] sm:$0xff]  ;;  %v83_v44 = vld [vmem:[%s791_s1 + $0x210] sm:$0xff] }
  0x17   :  { %227 = vmatpush.xpose.msra.mxu1 %v88_v17  ;;  %264 = vmatpush.xpose.msra.mxu3 %v111_v28  ;;  %v38_v43 = vld [vmem:[%s791_s1 + $0xa8] sm:$0xff]  ;;  %v39_v45 = vld [vmem:[%s791_s1 + $0xb0] sm:$0xff]  ;;  %v33_v46 = vld [vmem:[%s791_s1 + $0x80] sm:$0xff] }
  0x18   :  { %v31_v47 = vld [vmem:[%s791_s1 + $0x70] sm:$0xff]  ;;  %v76_v48 = vld [vmem:[%s791_s1 + $0x1d8] sm:$0xff]  ;;  %v26_v50 = vld [vmem:[%s791_s1 + $0x48] sm:$0xff] }
  0x19   :  { %v32_v49 = vld [vmem:[%s791_s1 + $0x78] sm:$0xff]  ;;  %v69_v52 = vld [vmem:[%s791_s1 + $0x1a0] sm:$0xff]  ;;  %v19_v54 = vld [vmem:[%s791_s1 + $0x10] sm:$0xff] }
  0x1a   :  { %248 = vmatpush.xpose.msra.mxu2 %v82_v19  ;;  %208 = vmatpush.xpose.msra.mxu0 %v80_v20  ;;  %v24_v51 = vld [vmem:[%s791_s1 + $0x38] sm:$0xff]  ;;  %v25_v53 = vld [vmem:[%s791_s1 + $0x40] sm:$0xff]  ;;  %v62_v56 = vld [vmem:[%s791_s1 + $0x168] sm:$0xff] }
  0x1b   :  { %228 = vmatpush.xpose.msra.mxu1 %v81_v21  ;;  %265 = vmatpush.xpose.msra.mxu3 %v104_v32  ;;  %v17_v55 = vld [vmem:[%s791_s1] sm:$0xff]  ;;  %v128_v57 = vld [vmem:[%s791_s1 + $0x378] sm:$0xff]  ;;  %v126_v58 = vld [vmem:[%s791_s1 + $0x368] sm:$0xff] }
  0x1c   :  { %v18_v59 = vld [vmem:[%s791_s1 + $0x8] sm:$0xff]  ;;  %v127_v60 = vld [vmem:[%s791_s1 + $0x370] sm:$0xff]  ;;  %v121_v62 = vld [vmem:[%s791_s1 + $0x340] sm:$0xff] }
  0x1d   :  { %v55_v61 = vld [vmem:[%s791_s1 + $0x130] sm:$0xff]  ;;  %v120_v0 = vld [vmem:[%s791_s1 + $0x338] sm:$0xff]  ;;  %v114_v2 = vld [vmem:[%s791_s1 + $0x308] sm:$0xff] }
  0x1e   :  { %249 = vmatpush.xpose.msra.mxu2 %v75_v23  ;;  %209 = vmatpush.xpose.msra.mxu0 %v73_v24  ;;  %v119_v63 = vld [vmem:[%s791_s1 + $0x330] sm:$0xff]  ;;  %v48_v1 = vld [vmem:[%s791_s1 + $0xf8] sm:$0xff]  ;;  %v113_v4 = vld [vmem:[%s791_s1 + $0x300] sm:$0xff] }
  0x1f   :  { %229 = vmatpush.xpose.msra.mxu1 %v74_v25  ;;  %266 = vmatpush.xpose.msra.mxu3 %v97_v36  ;;  %v112_v3 = vld [vmem:[%s791_s1 + $0x2f8] sm:$0xff]  ;;  %v41_v5 = vld [vmem:[%s791_s1 + $0xc0] sm:$0xff]  ;;  %v107_v6 = vld [vmem:[%s791_s1 + $0x2d0] sm:$0xff] }
  0x20   :  { %v105_v7 = vld [vmem:[%s791_s1 + $0x2c0] sm:$0xff]  ;;  %v106_v8 = vld [vmem:[%s791_s1 + $0x2c8] sm:$0xff]  ;;  %v100_v10 = vld [vmem:[%s791_s1 + $0x298] sm:$0xff] }
  0x21   :  { %v34_v9 = vld [vmem:[%s791_s1 + $0x88] sm:$0xff]  ;;  %v15_v12 = vld [vmem:[%s790_s0] sm:$0xff]  ;;  %v99_v13 = vld [vmem:[%s791_s1 + $0x290] sm:$0xff] }
  0x22   :  { %250 = vmatpush.xpose.msra.mxu2 %v68_v26  ;;  %210 = vmatpush.xpose.msra.mxu0 %v66_v27  ;;  %v98_v11 = vld [vmem:[%s791_s1 + $0x288] sm:$0xff]  ;;  %135 = vst [vmem:[#allocation1] ss:$4 sm:$0xff] %v15_v12  ;;  %v27_v14 = vld [vmem:[%s791_s1 + $0x50] sm:$0xff]  ;;  %v93_v15 = vld [vmem:[%s791_s1 + $0x260] sm:$0xff] }
  0x23   :  { %230 = vmatpush.xpose.msra.mxu1 %v67_v29  ;;  %267 = vmatpush.xpose.msra.mxu3 %v90_v40  ;;  %v91_v16 = vld [vmem:[%s791_s1 + $0x250] sm:$0xff]  ;;  %v92_v17 = vld [vmem:[%s791_s1 + $0x258] sm:$0xff]  ;;  %v86_v19 = vld [vmem:[%s791_s1 + $0x228] sm:$0xff] }
  0x24   :  { %v20_v18 = vld [vmem:[%s791_s1 + $0x18] sm:$0xff]  ;;  %v16_v22 = vld [vmem:[%s790_s0 + $0x8] sm:$0x3f]  ;;  %v85_v23 = vld [vmem:[%s791_s1 + $0x220] sm:$0xff] }
  0x25   :  { %v84_v20 = vld [vmem:[%s791_s1 + $0x218] sm:$0xff]  ;;  %137 = vst [vmem:[#allocation1 + $0x20] ss:$4 sm:$0xff] %v16_v22  ;;  %v79_v26 = vld [vmem:[%s791_s1 + $0x1f0] sm:$0xff]  ;;  %v77_v27 = vld [vmem:[%s791_s1 + $0x1e0] sm:$0xff] }
  0x26   :  { %251 = vmatpush.xpose.msra.mxu2 %v61_v30  ;;  %211 = vmatpush.xpose.msra.mxu0 %v59_v31  ;;  %v78_v29 = vld [vmem:[%s791_s1 + $0x1e8] sm:$0xff]  ;;  %v72_v30 = vld [vmem:[%s791_s1 + $0x1b8] sm:$0xff]  ;;  %v71_v32 = vld [vmem:[%s791_s1 + $0x1b0] sm:$0xff] }
  0x27   :  { %231 = vmatpush.xpose.msra.mxu1 %v60_v33  ;;  %268 = vmatpush.xpose.msra.mxu3 %v83_v44  ;;  %v70_v31 = vld [vmem:[%s791_s1 + $0x1a8] sm:$0xff]  ;;  %v65_v33 = vld [vmem:[%s791_s1 + $0x180] sm:$0xff]  ;;  %v43_v44 = vld [vmem:[%s791_s1 + $0xd0] sm:$0xff] }
  0x28   :  { %v58_v36 = vld [vmem:[%s791_s1 + $0x148] sm:$0xff]  ;;  %v49_v40 = vld [vmem:[%s791_s1 + $0x100] sm:$0xff] }
  0x29   :  { %v140_v21 = vld.sshfl [vmem:[#allocation1 + $0x10] sm:$0xff pattern:$0x73625140]  ;;  %v138_v24 = vld.sshfl [vmem:[#allocation1] sm:$0xff pattern:$0x73625140] }
  0x2a   :  { %252 = vmatpush.xpose.msra.mxu2 %v54_v34  ;;  %212 = vmatpush.xpose.msra.mxu0 %v52_v35  ;;  %v141_v25 = vld.sshfl [vmem:[#allocation1 + $0x18] sm:$0xff pattern:$0x73625140]  ;;  %v139_v28 = vld.sshfl [vmem:[#allocation1 + $0x8] sm:$0xff pattern:$0x73625140] }
  0x2b   :  { %232 = vmatpush.xpose.msra.mxu1 %v53_v37  ;;  %269 = vmatpush.xpose.msra.mxu3 %v76_v48  ;;  %v63_v34 = vld [vmem:[%s791_s1 + $0x170] sm:$0xff]  ;;  %v64_v35 = vld [vmem:[%s791_s1 + $0x178] sm:$0xff]  ;;  %v30_v48 = vld [vmem:[%s791_s1 + $0x68] sm:$0xff] }
  0x2c   :  { %v56_v37 = vld [vmem:[%s791_s1 + $0x138] sm:$0xff] }
  0x2e   :  { %253 = vmatpush.xpose.msra.mxu2 %v47_v38  ;;  %213 = vmatpush.xpose.msra.mxu0 %v45_v39  ;;  %v57_v38 = vld [vmem:[%s791_s1 + $0x140] sm:$0xff]  ;;  %v51_v39 = vld [vmem:[%s791_s1 + $0x110] sm:$0xff] }
  0x2f   :  { %233 = vmatpush.xpose.msra.mxu1 %v46_v41  ;;  %270 = vmatpush.xpose.msra.mxu3 %v69_v52  ;;  %v50_v41 = vld [vmem:[%s791_s1 + $0x108] sm:$0xff]  ;;  %v21_v52 = vld [vmem:[%s791_s1 + $0x20] sm:$0xff] }
  0x32   :  { %254 = vmatpush.xpose.msra.mxu2 %v40_v42  ;;  %214 = vmatpush.xpose.msra.mxu0 %v38_v43  ;;  %v44_v42 = vld [vmem:[%s791_s1 + $0xd8] sm:$0xff]  ;;  %v42_v43 = vld [vmem:[%s791_s1 + $0xc8] sm:$0xff] }
  0x33   :  { %234 = vmatpush.xpose.msra.mxu1 %v39_v45  ;;  %271 = vmatpush.xpose.msra.mxu3 %v62_v56  ;;  %v37_v45 = vld [vmem:[%s791_s1 + $0xa0] sm:$0xff]  ;;  %v143_v56 = vld.sshfl [vmem:[#allocation1 + $0x28] sm:$0xff pattern:$0x73625140] }
  0x36   :  { %255 = vmatpush.xpose.msra.mxu2 %v33_v46  ;;  %215 = vmatpush.xpose.msra.mxu0 %v31_v47  ;;  %v35_v46 = vld [vmem:[%s791_s1 + $0x90] sm:$0xff]  ;;  %v36_v47 = vld [vmem:[%s791_s1 + $0x98] sm:$0xff] }
  0x37   :  { %235 = vmatpush.xpose.msra.mxu1 %v32_v49  ;;  %272 = vmatpush.xpose.msra.mxu3 %v55_v61  ;;  %v28_v49 = vld [vmem:[%s791_s1 + $0x58] sm:$0xff] }
  0x3a   :  { %256 = vmatpush.xpose.msra.mxu2 %v26_v50  ;;  %216 = vmatpush.xpose.msra.mxu0 %v24_v51  ;;  %v29_v50 = vld [vmem:[%s791_s1 + $0x60] sm:$0xff]  ;;  %v23_v51 = vld [vmem:[%s791_s1 + $0x30] sm:$0xff] }
  0x3b   :  { %236 = vmatpush.xpose.msra.mxu1 %v25_v53  ;;  %273 = vmatpush.xpose.msra.mxu3 %v48_v1  ;;  %v22_v53 = vld [vmem:[%s791_s1 + $0x28] sm:$0xff]  ;;  %s404_s1 = smov [#allocation2]  }
  0x3c   :  { %s348_s24 = sshll.u32 %s404_s1, 4  ;;  %s349_s24 = int_to_ptr.vmem [resolvable:$true] %s348_s24 }
  0x3e   :  { %257 = vmatpush.xpose.msra.mxu2 %v19_v54  ;;  %217 = vmatpush.xpose.msra.mxu0 %v17_v55  ;;  %v144_v54 = vld.sshfl [vmem:[#allocation1 + $0x30] sm:$0xff pattern:$0x73625140]  ;;  %v142_v55 = vld.sshfl [vmem:[#allocation1 + $0x20] sm:$0xff pattern:$0x73625140] }
  0x3f   :  { %237 = vmatpush.xpose.msra.mxu1 %v18_v59  ;;  %274 = vmatpush.xpose.msra.mxu3 %v41_v5 }
  0x41   :  { %258 = vmatmul.f32.vlgmr.msra.gmra.mxu2 %v140_v21  ;;  %218 = vmatmul.f32.vlgmr.msra.gmra.mxu0 %v138_v24 }
  0x42   :  { %359 = vmatpush.xpose.msk.msrb.mxu2 %vm151_vm0, %v128_v57  ;;  %282 = vmatpush.xpose.msrb.mxu0 %v126_v58  ;;  %v377_v57 = vld [vmem:[%s792_s2] ss:$0 sm:$0xff] }
  0x43   :  { %302 = vmatpush.xpose.msrb.mxu1 %v127_v60  ;;  %275 = vmatpush.xpose.msra.mxu3 %v34_v9 }
  0x44   :  { %238 = vmatmul.f32.vlgmr.msra.gmra.mxu1 %v139_v28 }
  0x46   :  { %360 = vmatpush.xpose.msk.msrb.mxu2 %vm151_vm0, %v121_v62  ;;  %283 = vmatpush.xpose.msrb.mxu0 %v119_v63 }
  0x47   :  { %303 = vmatpush.xpose.msrb.mxu1 %v120_v0  ;;  %276 = vmatpush.xpose.msra.mxu3 %v27_v14 }
  0x4a   :  { %361 = vmatpush.xpose.msk.msrb.mxu2 %vm151_vm0, %v114_v2  ;;  %284 = vmatpush.xpose.msrb.mxu0 %v112_v3 }
  0x4b   :  { %304 = vmatpush.xpose.msrb.mxu1 %v113_v4  ;;  %277 = vmatpush.xpose.msra.mxu3 %v20_v18 }
  0x4e   :  { %362 = vmatpush.xpose.msk.msrb.mxu2 %vm151_vm0, %v107_v6  ;;  %285 = vmatpush.xpose.msrb.mxu0 %v105_v7 }
  0x4f   :  { %305 = vmatpush.xpose.msrb.mxu1 %v106_v8  ;;  %278 = vmatmul.f32.vlgmr.msra.gmra.mxu3 %v141_v25 }
  0x52   :  { %363 = vmatpush.xpose.msk.msrb.mxu2 %vm151_vm0, %v100_v10  ;;  %286 = vmatpush.xpose.msrb.mxu0 %v98_v11 }
  0x53   :  { %306 = vmatpush.xpose.msrb.mxu1 %v99_v13 }
  0x56   :  { %364 = vmatpush.xpose.msk.msrb.mxu2 %vm151_vm0, %v93_v15  ;;  %287 = vmatpush.xpose.msrb.mxu0 %v91_v16 }
  0x57   :  { %307 = vmatpush.xpose.msrb.mxu1 %v92_v17 }
  0x5a   :  { %365 = vmatpush.xpose.msk.msrb.mxu2 %vm151_vm0, %v86_v19  ;;  %288 = vmatpush.xpose.msrb.mxu0 %v84_v20 }
  0x5b   :  { %308 = vmatpush.xpose.msrb.mxu1 %v85_v23 }
  0x5e   :  { %366 = vmatpush.xpose.msk.msrb.mxu2 %vm151_vm0, %v79_v26  ;;  %289 = vmatpush.xpose.msrb.mxu0 %v77_v27 }
  0x5f   :  { %309 = vmatpush.xpose.msrb.mxu1 %v78_v29 }
  0x62   :  { %367 = vmatpush.xpose.msk.msrb.mxu2 %vm151_vm0, %v72_v30  ;;  %290 = vmatpush.xpose.msrb.mxu0 %v70_v31 }
  0x63   :  { %310 = vmatpush.xpose.msrb.mxu1 %v71_v32 }
  0x66   :  { %368 = vmatpush.xpose.msk.msrb.mxu2 %vm151_vm0, %v65_v33  ;;  %291 = vmatpush.xpose.msrb.mxu0 %v63_v34 }
  0x67   :  { %311 = vmatpush.xpose.msrb.mxu1 %v64_v35 }
  0x6a   :  { %369 = vmatpush.xpose.msk.msrb.mxu2 %vm151_vm0, %v58_v36  ;;  %292 = vmatpush.xpose.msrb.mxu0 %v56_v37 }
  0x6b   :  { %312 = vmatpush.xpose.msrb.mxu1 %v57_v38 }
  0x6e   :  { %370 = vmatpush.xpose.msk.msrb.mxu2 %vm151_vm0, %v51_v39  ;;  %293 = vmatpush.xpose.msrb.mxu0 %v49_v40 }
  0x6f   :  { %313 = vmatpush.xpose.msrb.mxu1 %v50_v41 }
  0x72   :  { %371 = vmatpush.xpose.msk.msrb.mxu2 %vm151_vm0, %v44_v42  ;;  %294 = vmatpush.xpose.msrb.mxu0 %v42_v43 }
  0x73   :  { %314 = vmatpush.xpose.msrb.mxu1 %v43_v44 }
  0x76   :  { %372 = vmatpush.xpose.msk.msrb.mxu2 %vm151_vm0, %v37_v45  ;;  %295 = vmatpush.xpose.msrb.mxu0 %v35_v46 }
  0x77   :  { %315 = vmatpush.xpose.msrb.mxu1 %v36_v47 }
  0x7a   :  { %373 = vmatpush.xpose.msk.msrb.mxu2 %vm151_vm0, %v30_v48  ;;  %296 = vmatpush.xpose.msrb.mxu0 %v28_v49 }
  0x7b   :  { %316 = vmatpush.xpose.msrb.mxu1 %v29_v50 }
  0x7e   :  { %374 = vmatpush.xpose.msk.msrb.mxu2 %vm151_vm0, %v23_v51  ;;  %297 = vmatpush.xpose.msrb.mxu0 %v21_v52 }
  0x7f   :  { %317 = vmatpush.xpose.msrb.mxu1 %v22_v53 }
  0x81   :  { %375 = vmatmul.msk.f32.vlgmr.msrb.gmra.mxu2 %vm151_vm0, %v144_v54  ;;  %298 = vmatmul.f32.vlgmr.msrb.gmra.mxu0 %v142_v55 }
  0x82   :  { %318 = vmatmul.f32.vlgmr.msrb.gmra.mxu1 %v143_v56 }
  0xbe   :  { %v219_v58 = vpop.f32.mrf.mxu0 }
  0xbf   :  { %v220_v59 = vadd.f32 %v377_v57, %v219_v58 }
  0xc1   :  { %v239_v60 = vpop.f32.mrf.mxu1 }
  0xc2   :  { %v240_v61 = vadd.f32 %v239_v60, %v220_v59 }
  0xc4   :  { %v259_v62 = vpop.f32.mrf.mxu2 }
  0xc5   :  { %v260_v63 = vadd.f32 %v259_v62, %v240_v61 }
  0xd2   :  { %v279_v0 = vpop.f32.mrf.mxu3 }
  0xd3   :  { %v280_v1 = vadd.f32 %v279_v0, %v260_v63 }
  0xfe   :  { %v299_v2 = vpop.f32.mrf.mxu0 }
  0xff   :  { %v300_v3 = vadd.f32 %v299_v2, %v280_v1  ;;  %v319_v4 = vpop.f32.mrf.mxu1 }
 0x101   :  { %v320_v5 = vadd.f32 %v319_v4, %v300_v3 }
 0x104   :  { %v339_v6 = vpop.f32.mrf.mxu2 }
 0x105   :  { %v340_v7 = vadd.f32 %v339_v6, %v320_v5 }
 0x107   :  { %342 = vst [vmem:[#allocation2] sm:$0x3] %v340_v7 }
 0x108   :  { %353 = dma.vmem_to_hbm [thread:$0]  %s349_s24, 32, %s351_s27, [#allocation3]  }
 0x109   :  { %402 = dma.done.wait [#allocation3], 32  }
 0x10a   :  { %403 = vsyncadd [#allocation3], 4294967264 }
 0x10b   :  { %358 = vsyncpa [#allocation3], 1 }

</bundles_post_ra>
